<compile_context>
chip_gen: v6e
topology: v6e:2x2x1
jax: 0.10.0
libtpu: 0.0.40
codegen_flags: <defaults>
</compile_context>

<pallas_src>
import functools

import jax
import jax.numpy as jnp
import numpy as np
from jax.experimental import pallas as pl
from jax.experimental.pallas import tpu as pltpu

EPS = 1e-8  # matches the module's `sqrt(var + 1e-08)`


# ----------------------------------------------------------------------------
# Hardware queries (best effort, safe fallbacks)
# ----------------------------------------------------------------------------
def _vmem_capacity_bytes():
    try:
        return int(pltpu.get_tpu_info().vmem_capacity_bytes)
    except Exception:
        return 64 * 1024 * 1024  # conservative: v7x per-TC VMEM


def _num_tensorcores():
    try:
        info = pltpu.get_tpu_info()
        for attr in ("num_cores", "core_count", "num_tensorcores",
                     "tensorcores_per_chip"):
            v = getattr(info, attr, None)
            if isinstance(v, int) and v > 0:
                return v
    except Exception:
        pass
    try:
        v = getattr(jax.devices()[0], "num_cores", None)
        if isinstance(v, int) and v > 0:
            return v
    except Exception:
        pass
    return 1


# ----------------------------------------------------------------------------
# Pallas kernel (one grid step = `bn` instances x `bc` channels)
#   x_ref : (bn, bc, T)  input block
#   c_ref : (bn, 1, S)   style codes for these instances
#   wg_ref: (S, bc)      gamma-Linear weight^T block
#   bg_ref: (1, bc)      gamma-Linear bias block
#   wb_ref: (S, bc)      beta-Linear weight^T block
#   bb_ref: (1, bc)      beta-Linear bias block
#   o_ref : (bn, bc, T)  output block (same layout/dtype as input)
# ----------------------------------------------------------------------------
def _cin_kernel(x_ref, c_ref, wg_ref, bg_ref, wb_ref, bb_ref, o_ref):
    x = x_ref[...].astype(jnp.float32)                 # [bn, bc, T]
    inv_t = jnp.float32(1.0 / x.shape[2])

    # Style linears for this channel block: two aligned MXU dots.
    cv = c_ref[...][:, 0, :].astype(jnp.float32)       # [bn, S]
    gamma = jnp.dot(cv, wg_ref[...],
                    preferred_element_type=jnp.float32) + bg_ref[...]   # [bn, bc]
    beta = jnp.dot(cv, wb_ref[...],
                   preferred_element_type=jnp.float32) + bb_ref[...]    # [bn, bc]

    # Two-pass per-(instance, channel) stats over T (lane reduction),
    # exactly matching torch: var = mean((x - u)^2). x is resident, so the
    # second pass is free in this HBM-bound regime.
    mean = jnp.sum(x, axis=2, keepdims=True) * inv_t   # [bn, bc, 1]
    xc = x - mean
    var = jnp.sum(xc * xc, axis=2, keepdims=True) * inv_t
    rstd = jax.lax.rsqrt(var + EPS)                    # 1/sqrt(var + eps)

    # out = (x - u)/std * gamma + beta as one FMA over the tile.
    scale = gamma[:, :, None] * rstd                   # [bn, bc, 1]
    o_ref[...] = (xc * scale + beta[:, :, None]).astype(o_ref.dtype)


# ----------------------------------------------------------------------------
# One-time parameter prep (outside the per-call forward path).
# PyTorch nn.Linear(style_num, dim_in): weight [C, S], bias [C].
# ----------------------------------------------------------------------------
def prepare_params(w_gamma, b_gamma, w_beta, b_beta):
    return (w_gamma.T, b_gamma[None, :], w_beta.T, b_beta[None, :])


# ----------------------------------------------------------------------------
# Block-size selection (generation aware)
# ----------------------------------------------------------------------------
def _pick_blocks(n, ch, t, itemsize, ncores, vmem_cap):
    # Bigger blocks amortize the ~0.35us/step overhead and push DMA efficiency
    # toward the HBM roofline; cap so 2x(in)+2x(out)+temps stays well inside
    # the scoped-VMEM budget of the current generation.
    target = 8 * 1024 * 1024 if vmem_cap >= 96 * 1024 * 1024 else 4 * 1024 * 1024
    inst_bytes = ch * t * itemsize

    if inst_bytes <= target:
        bc = ch
        bn = max(1, min(n, target // max(1, inst_bytes)))
        while n % bn:                     # must evenly tile the batch
            bn -= 1
        if ncores >= 2 and n >= 2 and (n // bn) % 2 != 0:
            # Multi-TC (v7x): prefer an even number of equal grid steps so
            # both TensorCores get identical work. On 1-TC chips keep the
            # biggest block (splitting is pure overhead).
            cand = bn
            while cand >= 1 and not (n % cand == 0 and (n // cand) % 2 == 0):
                cand -= 1
            if cand >= 1:
                bn = cand
    else:
        # Single instance exceeds the target: split the channel axis. Stats
        # are per-(n, c), so channel blocks are fully independent (no
        # reduction grid axis needed). bc must be a multiple of 128 (weight /
        # bias lane tiling) or the full C.
        bn = 1
        bc = ch
        rows = max(1, target // max(1, t * itemsize))
        for d in range(min(ch, rows), 0, -1):
            if ch % d == 0 and (d % 128 == 0 or d == ch):
                bc = d
                break
    return bn, bc


# ----------------------------------------------------------------------------
# Wrapper
# ----------------------------------------------------------------------------
@functools.partial(jax.jit, static_argnames=("block_n", "block_c"))
def conditional_instance_norm(x, c, w_gamma_t, b_gamma2, w_beta_t, b_beta2,
                              *, block_n=None, block_c=None):
    """x: [N, C, T], c: [N, S]. Returns [N, C, T] in x.dtype (PyTorch layout)."""
    n, ch, t = x.shape
    s = c.shape[1]

    vmem_cap = _vmem_capacity_bytes()
    bn, bc = _pick_blocks(n, ch, t, x.dtype.itemsize, _num_tensorcores(), vmem_cap)
    if block_n is not None:
        bn = block_n
    if block_c is not None:
        bc = block_c
    assert n % bn == 0 and ch % bc == 0, (n, bn, ch, bc)

    c3 = c[:, None, :]                                  # [N, 1, S] (block-friendly)

    # Explicit scoped-VMEM budget: double-buffered in + out blocks, ~3 block-
    # sized f32 kernel temps, small operands and slack; capped below physical.
    blk_bytes = bn * bc * t * x.dtype.itemsize
    vmem_limit = 4 * blk_bytes + 3 * bn * bc * t * 4 + (4 << 20)
    vmem_limit = int(max(16 << 20, min(vmem_limit, int(0.9 * vmem_cap))))

    return pl.pallas_call(
        _cin_kernel,
        out_shape=jax.ShapeDtypeStruct((n, ch, t), x.dtype),
        grid_spec=pltpu.PrefetchScalarGridSpec(
            num_scalar_prefetch=0,
            grid=(n // bn, ch // bc),
            in_specs=[
                pl.BlockSpec((bn, bc, t), lambda i, j: (i, j, 0)),
                pl.BlockSpec((bn, 1, s), lambda i, j: (i, 0, 0)),
                pl.BlockSpec((s, bc), lambda i, j: (0, j)),
                pl.BlockSpec((1, bc), lambda i, j: (0, j)),
                pl.BlockSpec((s, bc), lambda i, j: (0, j)),
                pl.BlockSpec((1, bc), lambda i, j: (0, j)),
            ],
            out_specs=pl.BlockSpec((bn, bc, t), lambda i, j: (i, j, 0)),
        ),
        compiler_params=pltpu.CompilerParams(
            dimension_semantics=("parallel", "parallel"),
            vmem_limit_bytes=vmem_limit),
    )(x, c3, w_gamma_t, b_gamma2, w_beta_t, b_beta2)


# ----------------------------------------------------------------------------
# Pure-JAX reference of the PyTorch forward (correctness check only)
# ----------------------------------------------------------------------------
def _reference(x, c, w_gamma, b_gamma, w_beta, b_beta):
    u = jnp.mean(x, axis=2, keepdims=True)
    var = jnp.mean((x - u) * (x - u), axis=2, keepdims=True)
    std = jnp.sqrt(var + EPS)
    gamma = (c @ w_gamma.T + b_gamma)[:, :, None]
    beta = (c @ w_beta.T + b_beta)[:, :, None]
    return (x - u) / std * gamma + beta


if __name__ == "__main__":
    # Small shapes consistent with the module: x [N, dim_in, T], c [N, style_num]
    N, C, S, T = 2, 4, 8, 16

    key = jax.random.PRNGKey(0)
    kx, kc, kwg, kbg, kwb, kbb = jax.random.split(key, 6)

    x = jax.random.normal(kx, (N, C, T), jnp.float32)
    c = jax.random.normal(kc, (N, S), jnp.float32)
    w_gamma = 0.2 * jax.random.normal(kwg, (C, S), jnp.float32)
    b_gamma = 1.0 + 0.1 * jax.random.normal(kbg, (C,), jnp.float32)
    w_beta = 0.2 * jax.random.normal(kwb, (C, S), jnp.float32)
    b_beta = 0.1 * jax.random.normal(kbb, (C,), jnp.float32)

    # Transpose / 2D-ify the style-linear params once, outside the forward path.
    params = prepare_params(w_gamma, b_gamma, w_beta, b_beta)

    out = jax.block_until_ready(conditional_instance_norm(x, c, *params))
    ref = jax.block_until_ready(_reference(x, c, w_gamma, b_gamma, w_beta, b_beta))

    assert out.shape == ref.shape == (N, C, T), out.shape
    np.testing.assert_allclose(np.asarray(out), np.asarray(ref),
                               rtol=1e-4, atol=1e-4)
    print("KERNEL_OK")
</pallas_src>

<mosaic_0001>
module attributes {stable_mosaic.version = 11 : i64} {
  func.func @_cin_kernel(%arg0: i32, %arg1: i32, %arg2: memref<2x4x16xf32, #tpu.memory_space<vmem>>, %arg3: memref<2x1x8xf32, #tpu.memory_space<vmem>>, %arg4: memref<8x4xf32, #tpu.memory_space<vmem>>, %arg5: memref<1x4xf32, #tpu.memory_space<vmem>>, %arg6: memref<8x4xf32, #tpu.memory_space<vmem>>, %arg7: memref<1x4xf32, #tpu.memory_space<vmem>>, %arg8: memref<2x4x16xf32, #tpu.memory_space<vmem>>) attributes {dimension_semantics = [#tpu.dimension_semantics<parallel>, #tpu.dimension_semantics<parallel>], iteration_bounds = array<i64: 1, 1>, scalar_prefetch = 0 : i64, scratch_operands = 0 : i64, tpu.core_type = #tpu.core_type<tc>, window_params = [{transform_indices = @transform_0, window_bounds = array<i64: 2, 4, 16>}, {transform_indices = @transform_1, window_bounds = array<i64: 2, 1, 8>}, {transform_indices = @transform_2, window_bounds = array<i64: 8, 4>}, {transform_indices = @transform_3, window_bounds = array<i64: 1, 4>}, {transform_indices = @transform_4, window_bounds = array<i64: 8, 4>}, {transform_indices = @transform_5, window_bounds = array<i64: 1, 4>}, {transform_indices = @transform_6, window_bounds = array<i64: 2, 4, 16>}]} {
    %c0 = arith.constant 0 : index
    %c0_0 = arith.constant 0 : index
    %c0_1 = arith.constant 0 : index
    %0 = vector.load %arg2[%c0, %c0_0, %c0_1] : memref<2x4x16xf32, #tpu.memory_space<vmem>>, vector<2x4x16xf32>
    %c0_2 = arith.constant 0 : index
    %c0_3 = arith.constant 0 : index
    %c0_4 = arith.constant 0 : index
    %1 = vector.load %arg3[%c0_2, %c0_3, %c0_4] : memref<2x1x8xf32, #tpu.memory_space<vmem>>, vector<2x1x8xf32>
    %2 = vector.shape_cast %1 : vector<2x1x8xf32> to vector<2x8xf32>
    %c0_5 = arith.constant 0 : index
    %c0_6 = arith.constant 0 : index
    %3 = vector.load %arg4[%c0_5, %c0_6] : memref<8x4xf32, #tpu.memory_space<vmem>>, vector<8x4xf32>
    %cst = arith.constant dense<0.000000e+00> : vector<2x4xf32>
    %4 = tpu.matmul %2, %3, %cst {dimension_numbers = #tpu.dot_dimension_numbers<[1], [0], [0], [1], [0, 0, 1, 1], [], []>} : vector<2x8xf32>, vector<8x4xf32>, vector<2x4xf32> -> vector<2x4xf32>
    %c0_7 = arith.constant 0 : index
    %c0_8 = arith.constant 0 : index
    %5 = vector.load %arg5[%c0_7, %c0_8] : memref<1x4xf32, #tpu.memory_space<vmem>>, vector<1x4xf32>
    %6 = vector.broadcast %5 : vector<1x4xf32> to vector<2x4xf32>
    %7 = arith.addf %4, %6 : vector<2x4xf32>
    %c0_9 = arith.constant 0 : index
    %c0_10 = arith.constant 0 : index
    %8 = vector.load %arg6[%c0_9, %c0_10] : memref<8x4xf32, #tpu.memory_space<vmem>>, vector<8x4xf32>
    %cst_11 = arith.constant dense<0.000000e+00> : vector<2x4xf32>
    %9 = tpu.matmul %2, %8, %cst_11 {dimension_numbers = #tpu.dot_dimension_numbers<[1], [0], [0], [1], [0, 0, 1, 1], [], []>} : vector<2x8xf32>, vector<8x4xf32>, vector<2x4xf32> -> vector<2x4xf32>
    %c0_12 = arith.constant 0 : index
    %c0_13 = arith.constant 0 : index
    %10 = vector.load %arg7[%c0_12, %c0_13] : memref<1x4xf32, #tpu.memory_space<vmem>>, vector<1x4xf32>
    %11 = vector.broadcast %10 : vector<1x4xf32> to vector<2x4xf32>
    %12 = arith.addf %9, %11 : vector<2x4xf32>
    %cst_14 = arith.constant dense<0.000000e+00> : vector<2x4xf32>
    %13 = vector.multi_reduction <add>, %0, %cst_14 [2] : vector<2x4x16xf32> to vector<2x4xf32>
    %14 = vector.shape_cast %13 : vector<2x4xf32> to vector<2x4x1xf32>
    %cst_15 = arith.constant 6.250000e-02 : f32
    %15 = vector.broadcast %cst_15 : f32 to vector<2x4x1xf32>
    %16 = arith.mulf %14, %15 : vector<2x4x1xf32>
    %17 = vector.broadcast %16 : vector<2x4x1xf32> to vector<2x4x16xf32>
    %18 = arith.subf %0, %17 : vector<2x4x16xf32>
    %19 = arith.mulf %18, %18 : vector<2x4x16xf32>
    %cst_16 = arith.constant dense<0.000000e+00> : vector<2x4xf32>
    %20 = vector.multi_reduction <add>, %19, %cst_16 [2] : vector<2x4x16xf32> to vector<2x4xf32>
    %21 = vector.shape_cast %20 : vector<2x4xf32> to vector<2x4x1xf32>
    %cst_17 = arith.constant 6.250000e-02 : f32
    %22 = vector.broadcast %cst_17 : f32 to vector<2x4x1xf32>
    %23 = arith.mulf %21, %22 : vector<2x4x1xf32>
    %cst_18 = arith.constant 9.99999993E-9 : f32
    %24 = vector.broadcast %cst_18 : f32 to vector<2x4x1xf32>
    %25 = arith.addf %23, %24 : vector<2x4x1xf32>
    %26 = math.rsqrt %25 : vector<2x4x1xf32>
    %27 = vector.shape_cast %7 : vector<2x4xf32> to vector<2x4x1xf32>
    %28 = arith.mulf %27, %26 : vector<2x4x1xf32>
    %29 = vector.broadcast %28 : vector<2x4x1xf32> to vector<2x4x16xf32>
    %30 = arith.mulf %18, %29 : vector<2x4x16xf32>
    %31 = vector.shape_cast %12 : vector<2x4xf32> to vector<2x4x1xf32>
    %32 = vector.broadcast %31 : vector<2x4x1xf32> to vector<2x4x16xf32>
    %33 = arith.addf %30, %32 : vector<2x4x16xf32>
    %c0_19 = arith.constant 0 : index
    %c0_20 = arith.constant 0 : index
    %c0_21 = arith.constant 0 : index
    %34 = vector.load %arg8[%c0_19, %c0_20, %c0_21] : memref<2x4x16xf32, #tpu.memory_space<vmem>>, vector<2x4x16xf32>
    tpu.vector_store %arg8[%c0_19, %c0_20, %c0_21], %33 {strides = array<i32>} : memref<2x4x16xf32, #tpu.memory_space<vmem>>, vector<2x4x16xf32>,
    return
  }
  func.func @transform_0(%arg0: i32, %arg1: i32) -> (i32, i32, i32) {
    %c0_i32 = arith.constant 0 : i32
    %c0_i32_0 = arith.constant 0 : i32
    return %arg0, %arg1, %c0_i32 : i32, i32, i32
  }
  func.func @transform_1(%arg0: i32, %arg1: i32) -> (i32, i32, i32) {
    %c0_i32 = arith.constant 0 : i32
    %c0_i32_0 = arith.constant 0 : i32
    %c0_i32_1 = arith.constant 0 : i32
    return %arg0, %c0_i32, %c0_i32_0 : i32, i32, i32
  }
  func.func @transform_2(%arg0: i32, %arg1: i32) -> (i32, i32) {
    %c0_i32 = arith.constant 0 : i32
    %c0_i32_0 = arith.constant 0 : i32
    return %c0_i32, %arg1 : i32, i32
  }
  func.func @transform_3(%arg0: i32, %arg1: i32) -> (i32, i32) {
    %c0_i32 = arith.constant 0 : i32
    %c0_i32_0 = arith.constant 0 : i32
    return %c0_i32, %arg1 : i32, i32
  }
  func.func @transform_4(%arg0: i32, %arg1: i32) -> (i32, i32) {
    %c0_i32 = arith.constant 0 : i32
    %c0_i32_0 = arith.constant 0 : i32
    return %c0_i32, %arg1 : i32, i32
  }
  func.func @transform_5(%arg0: i32, %arg1: i32) -> (i32, i32) {
    %c0_i32 = arith.constant 0 : i32
    %c0_i32_0 = arith.constant 0 : i32
    return %c0_i32, %arg1 : i32, i32
  }
  func.func @transform_6(%arg0: i32, %arg1: i32) -> (i32, i32, i32) {
    %c0_i32 = arith.constant 0 : i32
    %c0_i32_0 = arith.constant 0 : i32
    return %arg0, %arg1, %c0_i32 : i32, i32, i32
  }
}

</mosaic_0001>

<bundles_post_ra>
// kernel: conditional_instance_norm.1
= control target key start
LH: loop header
LB: loop body
LE: loop exit
PB: predicated region body
PF: predicated region fallthrough
CT: control target
= control target key end

     0   :  { %v42_v2 = vlaneseq  ;;  %v331_v3 = vmov 0.0   ;;  %vm332_vm0 = vmmov 0   ;;  %vm204_vm1 = vcmask 125952   ;;  %s405_s0 = inlined_call_operand.vmem [shape: f32[2,4,16], index: 0, kind: input, shape index: {}]   ;;  %s406_s1 = inlined_call_operand.vmem [shape: f32[2,1,8], index: 1, kind: input, shape index: {}]   ;;  %s407_s2 = inlined_call_operand.vmem [shape: f32[8,4], index: 2, kind: input, shape index: {}]   ;;  %s408_s3 = inlined_call_operand.vmem [shape: f32[1,4], index: 3, kind: input, shape index: {}]   ;;  %s409_s4 = inlined_call_operand.vmem [shape: f32[8,4], index: 4, kind: input, shape index: {}]   ;;  %s410_s5 = inlined_call_operand.vmem [shape: f32[1,4], index: 5, kind: input, shape index: {}]   ;;  %s411_s6 = inlined_call_operand.hbm [shape: f32[2,4,16], index: 6, kind: output, shape index: {}]  }
   0x1   :  { %v28_v0 = vld [vmem:[%s407_s2] sm:$0xff]  ;;  %289 = vmatprep.subr.mxu0 %v331_v3  ;;  %291 = vmatprep.mubr.msk.f32.mxu0 %vm332_vm0, %v331_v3  ;;  %v333_v6 = vmov 1966171168  }
   0x2   :  { %v26_v1 = vld [vmem:[%s406_s1] sm:$0x1]  ;;  %v27_v4 = vld [vmem:[%s406_s1 + $0x1] sm:$0x1]  ;;  %290 = vmatpush3.msra.mxu0 %v28_v0  ;;  %v40_v7 = vunpack.c.l.s4 %v333_v6  ;;  %v43_v8 = vshrl.u32 %v42_v2, 7  ;;  %294 = vmatprep.subr.mxu1 %v331_v3 }
   0x3   :  { %v126_v5 = vld [vmem:[%s409_s4] sm:$0xff]  ;;  %296 = vmatprep.mubr.msk.f32.mxu1 %vm332_vm0, %v331_v3 }
   0x4   :  { %v24_v9 = vld [vmem:[%s405_s0] sm:$0xf]  ;;  %v25_v10 = vld [vmem:[%s405_s0 + $0x4] sm:$0xf]  ;;  %295 = vmatpush3.msra.mxu1 %v126_v5 }
   0x5   :  { %v205_v11 = vsel %vm204_vm1, %v24_v9, 0.0 }
   0x6   :  { %11 = vsyncpa [#allocation3], 0  ;;  %v38_v12 = vcombine.low %v26_v1, %v27_v4  ;;  %v41_v13 = vunpack.c.0.s8 %v40_v7  ;;  %206 = vadd.xlane.f32.xlu0 %v205_v11  ;;  %v208_v14 = vsel %vm204_vm1, %v25_v10, 0.0  ;;  %vm53_vm2 = vcmask 64512   ;;  %v281_v28 = vld [vmem:[%s408_s3] ss:$0 sm:$0xff] }
   0x7   :  { %v283_v29 = vld [vmem:[%s410_s5] ss:$0 sm:$0xff]  ;;  %v231_v30 = vsub.s32 0, %v43_v8  ;;  %v238_v31 = vsub.s32 1, %v43_v8  ;;  %s334_s3 = smov [#allocation2]  }
   0x8   :  { %v44_v15 = vsub.s32 %v41_v13, %v43_v8  ;;  %s270_s5 = sshll.u32 %s334_s3, 4  ;;  %s271_s5 = int_to_ptr.vmem [resolvable:$true] %s270_s5 }
   0x9   :  { %s309_s9 = scalar_lea.vmem %s271_s5, 128  ;;  %p314_p1 = scmp.lt.s32.totalorder %s271_s5, %s271_s5 }
   0xa   :  { %v45_v16 = vrot.slane %v38_v12, %v44_v15  ;;  %209 = vadd.xlane.f32.xlu0 %v208_v14  ;;  %p310_p0 = scmp.ne.s32.totalorder %s271_s5, %s309_s9  ;;  %p315_p2 = scmp.lt.s32.totalorder %s309_s9, %s309_s9 }
   0xc   :  { %v52_v17 = vrot.slane %v45_v16, %v44_v15  ;;  %p316_p3 = por %p315_p2, %p314_p1 }
   0xe   :  { %292 = vmatmul.mubr.msk.f32.vlgmr.msra.gmra.mxu0 %vm53_vm2, %v52_v17  ;;  %297 = vmatmul.mubr.msk.f32.vlgmr.msra.gmra.mxu1 %vm53_vm2, %v52_v17  ;;  %p317_p4 = pnand %p316_p3, %p310_p0 }
  0x8f   :  { %v207_v18 = vpop.xlane.xlu0 %206 }
  0x90   :  { %v211_v19 = vmul.f32 0.0625, %v207_v18 }
  0x92   :  { %v213_v20 = vsub.f32 %v24_v9, %v211_v19 }
  0x93   :  { %v210_v21 = vpop.xlane.xlu0 %209 }
  0x94   :  { %v212_v22 = vmul.f32 0.0625, %v210_v21  ;;  %v215_v23 = vmul.f32 %v213_v20, %v213_v20 }
  0x96   :  { %v214_v24 = vsub.f32 %v25_v10, %v212_v22  ;;  %v217_v25 = vsel %vm204_vm1, %v215_v23, 0.0 }
  0x97   :  { %218 = vadd.xlane.f32.xlu1 %v217_v25 }
  0x98   :  { %v216_v26 = vmul.f32 %v214_v24, %v214_v24 }
  0x9a   :  { %v220_v27 = vsel %vm204_vm1, %v216_v26, 0.0 }
  0x9b   :  { %221 = vadd.xlane.f32.xlu1 %v220_v27 }
  0xce   :  { %v122_v32 = vpop.f32.mrf.mxu0  ;;  %v200_v33 = vpop.f32.mrf.mxu1 }
  0xcf   :  { %v123_v34 = vadd.f32 %v281_v28, %v122_v32  ;;  %v201_v35 = vadd.f32 %v283_v29, %v200_v33 }
  0xd0   :  { %v293_v36 = vpop.f32.mrf.mxu0  ;;  %v298_v37 = vpop.f32.mrf.mxu1 }
  0xd1   :  { %v232_v38 = vrot.slane %v123_v34, %v231_v30  ;;  %v239_v39 = vrot.slane %v123_v34, %v238_v31  ;;  %v250_v40 = vrot.slane %v201_v35, %v231_v30  ;;  %v257_v41 = vrot.slane %v201_v35, %v238_v31 }
  0xd3   :  { %234 = vbcast.lane.b32.xlu0 %v232_v38, 256  ;;  %241 = vbcast.lane.b32.xlu1 %v239_v39, 256 }
  0xd7   :  { %252 = vbcast.lane.b32.xlu1 %v250_v40, 256 }
  0xdb   :  { %259 = vbcast.lane.b32.xlu1 %v257_v41, 256 }
 0x120   :  { %v219_v42 = vpop.xlane.xlu1 %218 }
 0x121   :  { %v223_v44 = vmul.f32 0.0625, %v219_v42 }
 0x123   :  { %v225_v46 = vadd.f32 1e-08, %v223_v44 }
 0x124   :  { %v222_v43 = vpop.xlane.xlu1 %221 }
 0x125   :  { %v224_v45 = vmul.f32 0.0625, %v222_v43  ;;  %305 = vrsqrt.f32 %v225_v46 }
 0x127   :  { %v226_v47 = vadd.f32 1e-08, %v224_v45 }
 0x129   :  { %307 = vrsqrt.f32 %v226_v47 }
 0x132   :  { %v306_v48 = vpop.eup %305 }
 0x136   :  { %v308_v49 = vpop.eup %307 }
 0x145   :  { %v242_v50 = vpop.permute.xlu1 %241  ;;  %v235_v51 = vpop.permute.xlu0 %234 }
 0x146   :  { %v243_v52 = vmul.f32 %v306_v48, %v235_v51  ;;  %v244_v53 = vmul.f32 %v308_v49, %v242_v50 }
 0x148   :  { %v245_v54 = vmul.f32 %v243_v52, %v213_v20  ;;  %v246_v57 = vmul.f32 %v244_v53, %v214_v24 }
 0x149   :  { %v253_v55 = vpop.permute.xlu1 %252 }
 0x14a   :  { %v261_v56 = vadd.f32 %v253_v55, %v245_v54 }
 0x14c   :  { %263 = vst.msk [vmem:[#allocation2] sm:$0xf] %vm204_vm1, %v261_v56 }
 0x14d   :  { %v260_v58 = vpop.permute.xlu1 %259 }
 0x14e   :  { %v262_v59 = vadd.f32 %v260_v58, %v246_v57 }
 0x150   :  { %264 = vst.msk [vmem:[#allocation2 + $0x4] sm:$0xf] %vm204_vm1, %v262_v59 }
 0x151   :  { %320 = shalt.err (!%p317_p4)
}
 0x152   :  { %s335_s10 = smov 64   ;;  %s336_s11 = smov 4  }
 0x153   :  { %276 = dma.vmem_to_hbm [thread:$0]  %s271_s5, 128, %s411_s6, [#allocation3], %s335_s10, %s335_s10, %s336_s11  }
 0x154   :  { %329 = dma.done.wait [#allocation3], 128  }
 0x155   :  { %330 = vsyncadd [#allocation3], 4294967168 }
 0x156   :  { %280 = vsyncpa [#allocation3], 1 }

</bundles_post_ra>
